<compile_context>
chip_gen: v5e
topology: v5e:2x2
jax: 0.10.0
libtpu: 0.0.40
codegen_flags: <defaults>
</compile_context>

<pallas_src>
import jax
import jax.numpy as jnp
from jax.experimental import pallas as pl
from jax.experimental.pallas import tpu as pltpu


def _round_up(x, m):
    return (x + m - 1) // m * m


def _linear_relu_kernel(x_ref, w_ref, b_ref, o_ref):
    # x_ref: (TM, desc_dim), w_ref: (desc_dim, TN), b_ref: (1, TN), o_ref: (TM, TN)
    acc = jnp.dot(x_ref[...], w_ref[...], preferred_element_type=jnp.float32)  # MXU, f32 acc
    acc = acc + b_ref[...]                                                     # bias broadcast
    o_ref[...] = jnp.maximum(acc, 0.0).astype(o_ref.dtype)                     # ReLU


def text_processor_forward(desc, weight_t, bias, *,
                           use_bf16_inputs=False,
                           tm_cap=2048,
                           vmem_limit_bytes=48 * 1024 * 1024):
    """desc:     (bs, num_classes, desc_dim)
       weight_t: (desc_dim, hid_dim)   (transposed nn.Linear weight)
       bias:     (hid_dim,)
       returns:  (bs, num_classes, hid_dim) = relu(desc @ W^T + b)
    """
    bs, num_classes, desc_dim = desc.shape
    hid_dim = weight_t.shape[1]
    M = bs * num_classes
    out_dtype = desc.dtype

    x = desc.reshape(M, desc_dim)
    w = weight_t
    sublane = 8
    if use_bf16_inputs:
        # Halves HBM traffic for x/W; MXU still accumulates in f32.
        x = x.astype(jnp.bfloat16)
        w = w.astype(jnp.bfloat16)
        sublane = 16  # bf16 packs 16 sublanes per vreg
    b2d = bias.reshape(1, hid_dim).astype(jnp.float32)
    in_itemsize = int(x.dtype.itemsize)

    # ---- VMEM budget: leave headroom under the requested scoped limit ----
    budget = (int(vmem_limit_bytes) * 5) // 6

    # Conservative: assume 2 buffers even for the "resident" W/bias (true whenever the
    # single-buffer pipeline_mode hint is unavailable).
    def wb_bytes(tn):
        return 2 * (desc_dim * tn * in_itemsize + tn * 4)

    # ---- hidden (N) tile: whole W resident if it fits, else stream 128-aligned tiles
    if wb_bytes(hid_dim) <= budget // 2:
        TN = hid_dim
    else:
        tn_fit = (budget // 2) // (2 * (desc_dim * in_itemsize + 4))
        TN = max(128, (tn_fit // 128) * 128)
        TN = min(TN, _round_up(hid_dim, 128))
    gn = pl.cdiv(hid_dim, TN)

    # ---- row (M) tile from the remaining budget (x + out tiles are double-buffered)
    remaining = max(0, budget - wb_bytes(TN))
    per_row = 2 * (desc_dim * in_itemsize + TN * 4)
    tm_fit = max(sublane, remaining // per_row)
    TM = int(min(tm_cap, _round_up(M, sublane), tm_fit))
    TM = max(sublane, (TM // sublane) * sublane)
    # Guarantee >=2 row tiles when M allows it so megacore (v7x, 2 TCs) gets work.
    if pl.cdiv(M, TM) < 2 and M > sublane:
        TM = max(sublane, _round_up(pl.cdiv(M, 2), sublane))
    gm = pl.cdiv(M, TM)

    grid = (gn, gm)  # N outer (each W column tile loaded once), M inner

    cost = pl.CostEstimate(
        flops=2 * M * desc_dim * hid_dim,
        transcendentals=0,
        bytes_accessed=(M * desc_dim * in_itemsize
                        + desc_dim * hid_dim * in_itemsize
                        + hid_dim * 4
                        + M * hid_dim * jnp.dtype(out_dtype).itemsize),
    )

    def _run(single_buffer_wb):
        if single_buffer_wb:
            # Constant index map across the whole grid -> one VMEM buffer is enough.
            w_spec = pl.BlockSpec((desc_dim, TN), lambda j, i: (0, j),
                                  pipeline_mode=pl.Buffered(1))
            b_spec = pl.BlockSpec((1, TN), lambda j, i: (0, j),
                                  pipeline_mode=pl.Buffered(1))
        else:
            w_spec = pl.BlockSpec((desc_dim, TN), lambda j, i: (0, j))
            b_spec = pl.BlockSpec((1, TN), lambda j, i: (0, j))
        return pl.pallas_call(
            _linear_relu_kernel,
            out_shape=jax.ShapeDtypeStruct((M, hid_dim), out_dtype),
            grid_spec=pltpu.PrefetchScalarGridSpec(
                num_scalar_prefetch=0,
                grid=grid,
                in_specs=[
                    pl.BlockSpec((TM, desc_dim), lambda j, i: (i, 0)),  # x row tile (pipelined)
                    w_spec,                                             # weight
                    b_spec,                                             # bias
                ],
                out_specs=pl.BlockSpec((TM, TN), lambda j, i: (i, j)),
            ),
            compiler_params=pltpu.CompilerParams(
                dimension_semantics=("parallel", "parallel"),
                vmem_limit_bytes=int(vmem_limit_bytes),
            ),
            cost_estimate=cost,
        )(x, w, b2d)

    if gn == 1:
        # Resident weight: try single-buffered W/bias; fall back to default double
        # buffering if this jax build does not support the pipeline_mode hint.
        try:
            out = _run(True)
        except Exception:
            out = _run(False)
    else:
        out = _run(False)

    return out.reshape(bs, num_classes, hid_dim)


def init_params(key, desc_dim, hid_dim):
    # TODO(synk): reset_parameters_util_x is not defined in the spec; use a deterministic
    # uniform (kaiming-uniform-ish) init — forward-pass semantics are unaffected.
    k_w, k_b = jax.random.split(key)
    bound = 1.0 / jnp.sqrt(desc_dim)
    # PyTorch weight shape is (hid_dim, desc_dim); we store the transpose for the matmul.
    weight_t = jax.random.uniform(
        k_w, (desc_dim, hid_dim), dtype=jnp.float32, minval=-bound, maxval=bound
    )
    bias = jax.random.uniform(
        k_b, (hid_dim,), dtype=jnp.float32, minval=-bound, maxval=bound
    )
    return weight_t, bias


if __name__ == "__main__":
    key = jax.random.PRNGKey(0)
    k_in, k_p = jax.random.split(key)

    bs, num_classes, desc_dim, hid_dim = 2, 8, 32, 64
    desc = jax.random.normal(k_in, (bs, num_classes, desc_dim), dtype=jnp.float32)
    weight_t, bias = init_params(k_p, desc_dim, hid_dim)

    out = text_processor_forward(desc, weight_t, bias)
    out = jax.block_until_ready(out)

    # Reference check in plain JAX (same semantics as the PyTorch forward).
    ref = jnp.maximum(desc.reshape(-1, desc_dim) @ weight_t + bias, 0.0)
    ref = ref.reshape(bs, num_classes, hid_dim)
    assert out.shape == (bs, num_classes, hid_dim)
    assert jnp.allclose(out, ref, atol=1e-5, rtol=1e-5)

    print("KERNEL_OK")
</pallas_src>

<mosaic_0001>
module attributes {stable_mosaic.version = 11 : i64} {
  func.func @_linear_relu_kernel(%arg0: i32, %arg1: i32, %arg2: memref<8x32xf32, #tpu.memory_space<vmem>>, %arg3: memref<32x64xf32, #tpu.memory_space<vmem>>, %arg4: memref<1x64xf32, #tpu.memory_space<vmem>>, %arg5: memref<8x64xf32, #tpu.memory_space<vmem>>) attributes {dimension_semantics = [#tpu.dimension_semantics<parallel>, #tpu.dimension_semantics<parallel>], iteration_bounds = array<i64: 1, 2>, scalar_prefetch = 0 : i64, scratch_operands = 0 : i64, tpu.core_type = #tpu.core_type<tc>, window_params = [{transform_indices = @transform_0, window_bounds = array<i64: 8, 32>}, {pipeline_mode = #tpu.pipeline_mode<synchronous>, transform_indices = @transform_1, window_bounds = array<i64: 32, 64>}, {pipeline_mode = #tpu.pipeline_mode<synchronous>, transform_indices = @transform_2, window_bounds = array<i64: 1, 64>}, {transform_indices = @transform_3, window_bounds = array<i64: 8, 64>}]} {
    %c0 = arith.constant 0 : index
    %c0_0 = arith.constant 0 : index
    %0 = vector.load %arg2[%c0, %c0_0] : memref<8x32xf32, #tpu.memory_space<vmem>>, vector<8x32xf32>
    %c0_1 = arith.constant 0 : index
    %c0_2 = arith.constant 0 : index
    %1 = vector.load %arg3[%c0_1, %c0_2] : memref<32x64xf32, #tpu.memory_space<vmem>>, vector<32x64xf32>
    %cst = arith.constant dense<0.000000e+00> : vector<8x64xf32>
    %2 = tpu.matmul %0, %1, %cst {dimension_numbers = #tpu.dot_dimension_numbers<[1], [0], [0], [1], [0, 0, 1, 1], [], []>} : vector<8x32xf32>, vector<32x64xf32>, vector<8x64xf32> -> vector<8x64xf32>
    %c0_3 = arith.constant 0 : index
    %c0_4 = arith.constant 0 : index
    %3 = vector.load %arg4[%c0_3, %c0_4] : memref<1x64xf32, #tpu.memory_space<vmem>>, vector<1x64xf32>
    %4 = vector.broadcast %3 : vector<1x64xf32> to vector<8x64xf32>
    %5 = arith.addf %2, %4 : vector<8x64xf32>
    %cst_5 = arith.constant 0.000000e+00 : f32
    %6 = vector.broadcast %cst_5 : f32 to vector<8x64xf32>
    %7 = arith.maximumf %5, %6 : vector<8x64xf32>
    %c0_6 = arith.constant 0 : index
    %c0_7 = arith.constant 0 : index
    %8 = vector.load %arg5[%c0_6, %c0_7] : memref<8x64xf32, #tpu.memory_space<vmem>>, vector<8x64xf32>
    tpu.vector_store %arg5[%c0_6, %c0_7], %7 {strides = array<i32>} : memref<8x64xf32, #tpu.memory_space<vmem>>, vector<8x64xf32>,
    return
  }
  func.func @transform_0(%arg0: i32, %arg1: i32) -> (i32, i32) {
    %c0_i32 = arith.constant 0 : i32
    %c0_i32_0 = arith.constant 0 : i32
    return %arg1, %c0_i32 : i32, i32
  }
  func.func @transform_1(%arg0: i32, %arg1: i32) -> (i32, i32) {
    %c0_i32 = arith.constant 0 : i32
    %c0_i32_0 = arith.constant 0 : i32
    return %c0_i32, %arg0 : i32, i32
  }
  func.func @transform_2(%arg0: i32, %arg1: i32) -> (i32, i32) {
    %c0_i32 = arith.constant 0 : i32
    %c0_i32_0 = arith.constant 0 : i32
    return %c0_i32, %arg0 : i32, i32
  }
  func.func @transform_3(%arg0: i32, %arg1: i32) -> (i32, i32) {
    %c0_i32 = arith.constant 0 : i32
    return %arg1, %arg0 : i32, i32
  }
}

module attributes {stable_mosaic.version = 11 : i64} {
  func.func @_linear_relu_kernel(%arg0: i32, %arg1: i32, %arg2: memref<8x32xf32, #tpu.memory_space<vmem>>, %arg3: memref<32x64xf32, #tpu.memory_space<vmem>>, %arg4: memref<1x64xf32, #tpu.memory_space<vmem>>, %arg5: memref<8x64xf32, #tpu.memory_space<vmem>>) attributes {dimension_semantics = [#tpu.dimension_semantics<parallel>, #tpu.dimension_semantics<parallel>], iteration_bounds = array<i64: 1, 2>, scalar_prefetch = 0 : i64, scratch_operands = 0 : i64, tpu.core_type = #tpu.core_type<tc>, window_params = [{transform_indices = @transform_0, window_bounds = array<i64: 8, 32>}, {transform_indices = @transform_1, window_bounds = array<i64: 32, 64>}, {transform_indices = @transform_2, window_bounds = array<i64: 1, 64>}, {transform_indices = @transform_3, window_bounds = array<i64: 8, 64>}]} {
    %c0 = arith.constant 0 : index
    %c0_0 = arith.constant 0 : index
    %0 = vector.load %arg2[%c0, %c0_0] : memref<8x32xf32, #tpu.memory_space<vmem>>, vector<8x32xf32>
    %c0_1 = arith.constant 0 : index
    %c0_2 = arith.constant 0 : index
    %1 = vector.load %arg3[%c0_1, %c0_2] : memref<32x64xf32, #tpu.memory_space<vmem>>, vector<32x64xf32>
    %cst = arith.constant dense<0.000000e+00> : vector<8x64xf32>
    %2 = tpu.matmul %0, %1, %cst {dimension_numbers = #tpu.dot_dimension_numbers<[1], [0], [0], [1], [0, 0, 1, 1], [], []>} : vector<8x32xf32>, vector<32x64xf32>, vector<8x64xf32> -> vector<8x64xf32>
    %c0_3 = arith.constant 0 : index
    %c0_4 = arith.constant 0 : index
    %3 = vector.load %arg4[%c0_3, %c0_4] : memref<1x64xf32, #tpu.memory_space<vmem>>, vector<1x64xf32>
    %4 = vector.broadcast %3 : vector<1x64xf32> to vector<8x64xf32>
    %5 = arith.addf %2, %4 : vector<8x64xf32>
    %cst_5 = arith.constant 0.000000e+00 : f32
    %6 = vector.broadcast %cst_5 : f32 to vector<8x64xf32>
    %7 = arith.maximumf %5, %6 : vector<8x64xf32>
    %c0_6 = arith.constant 0 : index
    %c0_7 = arith.constant 0 : index
    %8 = vector.load %arg5[%c0_6, %c0_7] : memref<8x64xf32, #tpu.memory_space<vmem>>, vector<8x64xf32>
    tpu.vector_store %arg5[%c0_6, %c0_7], %7 {strides = array<i32>} : memref<8x64xf32, #tpu.memory_space<vmem>>, vector<8x64xf32>,
    return
  }
  func.func @transform_0(%arg0: i32, %arg1: i32) -> (i32, i32) {
    %c0_i32 = arith.constant 0 : i32
    %c0_i32_0 = arith.constant 0 : i32
    return %arg1, %c0_i32 : i32, i32
  }
  func.func @transform_1(%arg0: i32, %arg1: i32) -> (i32, i32) {
    %c0_i32 = arith.constant 0 : i32
    %c0_i32_0 = arith.constant 0 : i32
    return %c0_i32, %arg0 : i32, i32
  }
  func.func @transform_2(%arg0: i32, %arg1: i32) -> (i32, i32) {
    %c0_i32 = arith.constant 0 : i32
    %c0_i32_0 = arith.constant 0 : i32
    return %c0_i32, %arg0 : i32, i32
  }
  func.func @transform_3(%arg0: i32, %arg1: i32) -> (i32, i32) {
    %c0_i32 = arith.constant 0 : i32
    return %arg1, %arg0 : i32, i32
  }
}

</mosaic_0001>

<bundles_post_ra>
// kernel: tpu_custom_call.1
= control target key start
LH: loop header
LB: loop body
LE: loop exit
PB: predicated region body
PF: predicated region fallthrough
CT: control target
= control target key end

     0   :  { %8 = vsyncpa [#allocation3], 0  ;;  %s806_s0 = inlined_call_operand.hbm [shape: f32[16,32], index: 0, kind: input, shape index: {}]   ;;  %s807_s1 = inlined_call_operand.hbm [shape: f32[32,64], index: 1, kind: input, shape index: {}]   ;;  %s808_s2 = inlined_call_operand.vmem [shape: f32[1,64], index: 2, kind: input, shape index: {}]   ;;  %s809_s3 = inlined_call_operand.hbm [shape: f32[16,64], index: 3, kind: output, shape index: {}]  }
   0x1   :  { %10 = vsyncpa [#allocation3 + $0x1], 0 }
   0x2   :  { %11 = vsyncpa [#allocation6], 0 }
   0x3   :  { %12 = vsyncpa [#allocation4], 0 }
   0x4   :  { %14 = vsyncpa [#allocation4 + $0x1], 0  ;;  %s660_s12 = smov 0   ;;  %s662_s13 = smov 0  }
   0x5   :  { %s664_s14 = smov 0   ;;  %s666_s15 = smov 0  }
   0x6   :  { %s668_s16 = smov 0   ;;  %s670_s17 = smov 0  }
   0x7 LB: > { %s396_s18 = sadd.s32 4294967295, %s635_s17   ;;  %p398_p0 = scmp.ge.s32.totalorder %s635_s17, 1  ;;  %s635_s17 = sphi %s670_s17, %s20_s17   ;;  %s631_s16 = sphi %s668_s16, %s820_s16   ;;  %s627_s15 = sphi %s666_s15, %s819_s15   ;;  %s623_s14 = sphi %s664_s14, %s818_s14   ;;  %s619_s13 = sphi %s662_s13, %s817_s13   ;;  %s615_s12 = sphi %s660_s12, %s816_s12  }
   0x8   : > { %p692_p1 = scmp.eq.s32.totalorder %s396_s18, 0  ;;  %p143_p2 = scmp.lt.s32.totalorder %s635_s17, 3 }
   0x9   : > { %s156_s22 = sshll.u32 %s807_s1, 4  ;;  %s637_s24 = smov [#allocation5]   ;;  %s157_s22 = int_to_ptr.hbm [resolvable:$true] %s156_s22 }
   0xa   : > { %p700_p3 = pnand %p398_p0, %p143_p2  ;;  %s158_s25 = sshll.u32 %s637_s24, 4  ;;  %s159_s25 = int_to_ptr.vmem [resolvable:$true] %s158_s25 }
   0xb   : > { %p401_p6 = scmp.ge.s32.totalorder %s635_s17, 2  ;;  %s638_s26 = smov 128  }
   0xc   : > { %p421_p4 = pneg %p700_p3  ;;  %s639_s27 = smov 8  }
   0xd   : > { %s397_s28 = sadd.s32 4294967294, %s635_s17   ;;  %s29_s29 = sadd.s32 1, %s631_s16 }
   0xe   : > { %p422_p5 = pnand %p421_p4, %p692_p1  ;;  %s39_s30 = sadd.s32 1, %s623_s14 }
   0xf   : > { %p30_p7 = scmp.ge.s32.totalorder %s29_s29, 2  ;;  %p46_p8 = scmp.ne.s32.totalorder %s623_s14, %s619_s13 }
  0x10   : > { %424 = dma.hbm_to_vmem [thread:$0]  (!%p422_p5), %s157_s22, 512, %s159_s25, [#allocation6], %s638_s26, %s638_s26, %s639_s27  }
  0x11   : > { %p47_p9 = scmp.eq.s32.totalorder %s635_s17, 0  ;;  %p52_p10 = scmp.ne.s32.totalorder %s619_s13, %s615_s12 }
  0x12   : > { %s822_s29 = smov (%p30_p7, %s29_s29), 0  ;;  %p130_p13 = scmp.eq.s32.totalorder %s396_s18, 1 }
  0x13   : > { %p719_p11 = por %p47_p9, %p46_p8  ;;  %p725_p12 = por %p692_p1, %p52_p10 }
  0x14   : > { %s36_s6 = ssub.s32 %s631_s16, %s822_s29  ;;  %p136_p2 = scmp.eq.s32.totalorder %s397_s28, 1 }
  0x15   : > { %p37_p0 = scmp.eq.s32.totalorder %s36_s6, 0  ;;  %p731_p4 = por %p130_p13, %p46_p8 }
  0x16   : > { %p434_p5 = scmp.lt.s32.totalorder %s635_s17, 2  ;;  %p739_p7 = por %p136_p2, %p52_p10 }
  0x17   : > { %s737_s8 = scalar_select %p37_p0, %s623_s14, %s39_s30  }
  0x18   : > { %s178_s10 = sand.u32 1, %s623_s14   ;;  %s403_s20 = sshll.u32 %s631_s16, 3 }
  0x19   : > { %s402_s11 = sshll.u32 %s178_s10, 3  ;;  %s186_s18 = scalar_lea.hbm %s806_s0, %s403_s20 }
  0x1a   : > { %s182_s24 = scalar_lea.vmem [#allocation2], %s402_s11  ;;  %s188_s26 = sshll.u32 %s186_s18, 4  ;;  %s189_s26 = int_to_ptr.hbm [resolvable:$true] %s188_s26 }
  0x1b   : > { %s190_s25 = sshll.u32 %s182_s24, 4  ;;  %p426_p8 = pnand %p434_p5, %p719_p11  ;;  %s191_s25 = int_to_ptr.vmem [resolvable:$true] %s190_s25 }
  0x1c   : > { %s179_s27 = scalar_lea.sflag [#allocation3], %s178_s10  ;;  %199 = sbr.rel (%p700_p3) target bundleno = 177 (0xb1), region = 32 }
  0x1d   : > { %428 = dma.hbm_to_vmem [thread:$0]  (!%p426_p8), %s189_s26, 128, %s191_s25, %s179_s27  }
  0x1e   : > { %s753_s28 = sand.u32 (!%p700_p3), 1, %s619_s13  }
  0x1f   : > { %s405_s30 = sshll.u32 (!%p700_p3), %s753_s28, 3  ;;  %s202_s6 = scalar_lea.sflag (!%p700_p3), [#allocation3], %s753_s28 }
  0x20   : > { %s205_s11 = scalar_lea.vmem (!%p700_p3), [#allocation2], %s405_s30 }
  0x21   : > { %602 = dma.done.wait (%p725_p12), %s202_s6, 128  }
  0x22   : > { %604 = vsyncadd (%p725_p12), %s202_s6, 4294967168 }
  0x23   : > { %606 = dma.done.wait (%p692_p1), [#allocation6], 512  }
  0x24   : > { %608 = vsyncadd (%p692_p1), [#allocation6], 4294966784  ;;  %v244_v0 = vld [vmem:[#allocation5 + $0x18] sm:$0xff]  ;;  %v243_v1 = vld [vmem:[#allocation5 + $0x10] sm:$0xff]  ;;  %vm249_vm0 = vcmask 261120   ;;  %s410_s23 = sshll.u32 %s627_s15, 3 }
  0x25   : > { %265 = vmatpush.msra.mxu0 %v244_v0  ;;  %v242_v2 = vld [vmem:[#allocation5 + $0x8] sm:$0xff]  ;;  %v241_v3 = vld [vmem:[#allocation5] sm:$0xff]  ;;  %v240_v4 = vld [vmem:[%s205_s11] sm:$0xff]  ;;  %s288_s20 = scalar_lea.hbm %s809_s3, %s410_s23  ;;  %s236_s21 = scalar_lea.vmem [#allocation7], %s405_s30  ;;  %vm274_vm1 = vcmask 523264  }
  0x26   : > { %v488_v5 = vld [vmem:[%s808_s2] ss:$0 sm:$0xff]  ;;  %s290_s22 = sshll.u32 %s236_s21, 4  ;;  %s292_s18 = sshll.u32 %s288_s20, 4  ;;  %s291_s22 = int_to_ptr.vmem [resolvable:$true] %s290_s22  ;;  %s293_s18 = int_to_ptr.hbm [resolvable:$true] %s292_s18 }
  0x27   : > { %266 = vmatpush.msra.mxu0 %v243_v1  ;;  %s277_s15 = scalar_lea.sflag [#allocation4], %s753_s28  ;;  %s563_s24 = sshra.s32 %s293_s18, 4  ;;  %s564_s24 = int_to_ptr.hbm [resolvable:$true] %s563_s24 }
  0x28   : > { %s565_s25 = scalar_lea.hbm %s564_s24, 8  ;;  %s569_s30 = scalar_lea.hbm %s809_s3, 16 }
  0x29   : > { %267 = vmatpush.msra.mxu0 %v242_v2  ;;  %p566_p1 = scmp.ne.s32.totalorder %s564_s24, %s565_s25  ;;  %p570_p10 = scmp.lt.s32.totalorder %s564_s24, %s809_s3 }
  0x2a   : > { %p571_p11 = scmp.lt.s32.totalorder %s569_s30, %s565_s25 }
  0x2b   : > { %268 = vmatpush.msra.mxu0 %v241_v3  ;;  %p567_p3 = pnand %p566_p1, %p731_p4 }
  0x2c   : > { %408 = vmatmul.msk.f32.vlgmr.msra.gmra.mxu0 %vm249_vm0, %v240_v4  ;;  %p572_p12 = por %p571_p11, %p570_p10 }
  0x2d   : > { %p568_p9 = pneg %p567_p3 }
  0x2f   : > { %p573_p13 = pnand %p572_p12, %p568_p9 }
  0xa9   : > { %v270_v6 = vpop.f32.mrf.mxu0 }
  0xaa   : > { %v271_v7 = vadd.f32 %v488_v5, %v270_v6 }
  0xac   : > { %v273_v8 = vmax.f32 %v271_v7, 0.0 }
  0xae   : > { %275 = vst.msk [vmem:[%s236_s21] sm:$0xff] %vm274_vm1, %v273_v8 }
  0xaf   : > { %576 = shalt.err (!%p573_p13)
}
  0xb0   : > { %419 = dma.vmem_to_hbm [thread:$0]  (%p731_p4), %s291_s22, 128, %s293_s18, %s277_s15  }
  0xb1 PF: > { %s304_s28 = sand.u32 1, %s615_s12   ;;  %p430_p0 = pnand %p401_p6, %p739_p7 }
  0xb2   : > { %s305_s23 = scalar_lea.sflag [#allocation4], %s304_s28 }
  0xb3   : > { %p431_p2 = pneg %p430_p0 }
  0xb5   : > { %610 = dma.done.wait (%p431_p2), %s305_s23, 128  }
  0xb6   : > { %612 = vsyncadd (%p431_p2), %s305_s23, 4294967168  ;;  %s20_s17 = sadd.s32 1, %s635_s17   ;;  %s816_s12 = smov %s619_s13 }
  0xb7   : > { %p17_p5 = scmp.ge.s32.totalorder %s20_s17, 4   ;;  %s817_s13 = smov %s623_s14 }
  0xb8   : > { %s818_s14 = smov %s737_s8  ;;  %s819_s15 = smov %s631_s16 }
  0xb9   : > { %s820_s16 = smov %s822_s29  ;;  %19 = sbr.rel (!%p17_p5) target bundleno = 7 (0x7), region = 85 }
  0xbe   :  { %311 = vsyncpa [#allocation3], 1 }
  0xbf   :  { %313 = vsyncpa [#allocation3 + $0x1], 1 }
  0xc0   :  { %314 = vsyncpa [#allocation6], 1 }
  0xc1   :  { %315 = vsyncpa [#allocation4], 1 }
  0xc2   :  { %317 = vsyncpa [#allocation4 + $0x1], 1 }

// kernel: tpu_custom_call.1
= control target key start
LH: loop header
LB: loop body
LE: loop exit
PB: predicated region body
PF: predicated region fallthrough
CT: control target
= control target key end

     0   :  { %8 = vsyncpa [#allocation3], 0  ;;  %s806_s0 = inlined_call_operand.hbm [shape: f32[16,32], index: 0, kind: input, shape index: {}]   ;;  %s807_s1 = inlined_call_operand.hbm [shape: f32[32,64], index: 1, kind: input, shape index: {}]   ;;  %s808_s2 = inlined_call_operand.vmem [shape: f32[1,64], index: 2, kind: input, shape index: {}]   ;;  %s809_s3 = inlined_call_operand.hbm [shape: f32[16,64], index: 3, kind: output, shape index: {}]  }
   0x1   :  { %10 = vsyncpa [#allocation3 + $0x1], 0 }
   0x2   :  { %11 = vsyncpa [#allocation6], 0 }
   0x3   :  { %12 = vsyncpa [#allocation4], 0 }
   0x4   :  { %14 = vsyncpa [#allocation4 + $0x1], 0  ;;  %s660_s12 = smov 0   ;;  %s662_s13 = smov 0  }
   0x5   :  { %s664_s14 = smov 0   ;;  %s666_s15 = smov 0  }
   0x6   :  { %s668_s16 = smov 0   ;;  %s670_s17 = smov 0  }
   0x7 LB: > { %s396_s18 = sadd.s32 4294967295, %s635_s17   ;;  %p398_p0 = scmp.ge.s32.totalorder %s635_s17, 1  ;;  %s635_s17 = sphi %s670_s17, %s20_s17   ;;  %s631_s16 = sphi %s668_s16, %s820_s16   ;;  %s627_s15 = sphi %s666_s15, %s819_s15   ;;  %s623_s14 = sphi %s664_s14, %s818_s14   ;;  %s619_s13 = sphi %s662_s13, %s817_s13   ;;  %s615_s12 = sphi %s660_s12, %s816_s12  }
   0x8   : > { %p692_p1 = scmp.eq.s32.totalorder %s396_s18, 0  ;;  %p143_p2 = scmp.lt.s32.totalorder %s635_s17, 3 }
   0x9   : > { %s156_s22 = sshll.u32 %s807_s1, 4  ;;  %s637_s24 = smov [#allocation5]   ;;  %s157_s22 = int_to_ptr.hbm [resolvable:$true] %s156_s22 }
   0xa   : > { %p700_p3 = pnand %p398_p0, %p143_p2  ;;  %s158_s25 = sshll.u32 %s637_s24, 4  ;;  %s159_s25 = int_to_ptr.vmem [resolvable:$true] %s158_s25 }
   0xb   : > { %p401_p6 = scmp.ge.s32.totalorder %s635_s17, 2  ;;  %s638_s26 = smov 128  }
   0xc   : > { %p421_p4 = pneg %p700_p3  ;;  %s639_s27 = smov 8  }
   0xd   : > { %s397_s28 = sadd.s32 4294967294, %s635_s17   ;;  %s29_s29 = sadd.s32 1, %s631_s16 }
   0xe   : > { %p422_p5 = pnand %p421_p4, %p692_p1  ;;  %s39_s30 = sadd.s32 1, %s623_s14 }
   0xf   : > { %p30_p7 = scmp.ge.s32.totalorder %s29_s29, 2  ;;  %p46_p8 = scmp.ne.s32.totalorder %s623_s14, %s619_s13 }
  0x10   : > { %424 = dma.hbm_to_vmem [thread:$0]  (!%p422_p5), %s157_s22, 512, %s159_s25, [#allocation6], %s638_s26, %s638_s26, %s639_s27  }
  0x11   : > { %p47_p9 = scmp.eq.s32.totalorder %s635_s17, 0  ;;  %p52_p10 = scmp.ne.s32.totalorder %s619_s13, %s615_s12 }
  0x12   : > { %s822_s29 = smov (%p30_p7, %s29_s29), 0  ;;  %p130_p13 = scmp.eq.s32.totalorder %s396_s18, 1 }
  0x13   : > { %p719_p11 = por %p47_p9, %p46_p8  ;;  %p725_p12 = por %p692_p1, %p52_p10 }
  0x14   : > { %s36_s6 = ssub.s32 %s631_s16, %s822_s29  ;;  %p136_p2 = scmp.eq.s32.totalorder %s397_s28, 1 }
  0x15   : > { %p37_p0 = scmp.eq.s32.totalorder %s36_s6, 0  ;;  %p731_p4 = por %p130_p13, %p46_p8 }
  0x16   : > { %p434_p5 = scmp.lt.s32.totalorder %s635_s17, 2  ;;  %p739_p7 = por %p136_p2, %p52_p10 }
  0x17   : > { %s737_s8 = scalar_select %p37_p0, %s623_s14, %s39_s30  }
  0x18   : > { %s178_s10 = sand.u32 1, %s623_s14   ;;  %s403_s20 = sshll.u32 %s631_s16, 3 }
  0x19   : > { %s402_s11 = sshll.u32 %s178_s10, 3  ;;  %s186_s18 = scalar_lea.hbm %s806_s0, %s403_s20 }
  0x1a   : > { %s182_s24 = scalar_lea.vmem [#allocation2], %s402_s11  ;;  %s188_s26 = sshll.u32 %s186_s18, 4  ;;  %s189_s26 = int_to_ptr.hbm [resolvable:$true] %s188_s26 }
  0x1b   : > { %s190_s25 = sshll.u32 %s182_s24, 4  ;;  %p426_p8 = pnand %p434_p5, %p719_p11  ;;  %s191_s25 = int_to_ptr.vmem [resolvable:$true] %s190_s25 }
  0x1c   : > { %s179_s27 = scalar_lea.sflag [#allocation3], %s178_s10  ;;  %199 = sbr.rel (%p700_p3) target bundleno = 177 (0xb1), region = 32 }
  0x1d   : > { %428 = dma.hbm_to_vmem [thread:$0]  (!%p426_p8), %s189_s26, 128, %s191_s25, %s179_s27  }
  0x1e   : > { %s753_s28 = sand.u32 (!%p700_p3), 1, %s619_s13  }
  0x1f   : > { %s405_s30 = sshll.u32 (!%p700_p3), %s753_s28, 3  ;;  %s202_s6 = scalar_lea.sflag (!%p700_p3), [#allocation3], %s753_s28 }
  0x20   : > { %s205_s11 = scalar_lea.vmem (!%p700_p3), [#allocation2], %s405_s30 }
  0x21   : > { %602 = dma.done.wait (%p725_p12), %s202_s6, 128  }
  0x22   : > { %604 = vsyncadd (%p725_p12), %s202_s6, 4294967168 }
  0x23   : > { %606 = dma.done.wait (%p692_p1), [#allocation6], 512  }
  0x24   : > { %608 = vsyncadd (%p692_p1), [#allocation6], 4294966784  ;;  %v244_v0 = vld [vmem:[#allocation5 + $0x18] sm:$0xff]  ;;  %v243_v1 = vld [vmem:[#allocation5 + $0x10] sm:$0xff]  ;;  %vm249_vm0 = vcmask 261120   ;;  %s410_s23 = sshll.u32 %s627_s15, 3 }
  0x25   : > { %265 = vmatpush.msra.mxu0 %v244_v0  ;;  %v242_v2 = vld [vmem:[#allocation5 + $0x8] sm:$0xff]  ;;  %v241_v3 = vld [vmem:[#allocation5] sm:$0xff]  ;;  %v240_v4 = vld [vmem:[%s205_s11] sm:$0xff]  ;;  %s288_s20 = scalar_lea.hbm %s809_s3, %s410_s23  ;;  %s236_s21 = scalar_lea.vmem [#allocation7], %s405_s30  ;;  %vm274_vm1 = vcmask 523264  }
  0x26   : > { %v488_v5 = vld [vmem:[%s808_s2] ss:$0 sm:$0xff]  ;;  %s290_s22 = sshll.u32 %s236_s21, 4  ;;  %s292_s18 = sshll.u32 %s288_s20, 4  ;;  %s291_s22 = int_to_ptr.vmem [resolvable:$true] %s290_s22  ;;  %s293_s18 = int_to_ptr.hbm [resolvable:$true] %s292_s18 }
  0x27   : > { %266 = vmatpush.msra.mxu0 %v243_v1  ;;  %s277_s15 = scalar_lea.sflag [#allocation4], %s753_s28  ;;  %s563_s24 = sshra.s32 %s293_s18, 4  ;;  %s564_s24 = int_to_ptr.hbm [resolvable:$true] %s563_s24 }
  0x28   : > { %s565_s25 = scalar_lea.hbm %s564_s24, 8  ;;  %s569_s30 = scalar_lea.hbm %s809_s3, 16 }
  0x29   : > { %267 = vmatpush.msra.mxu0 %v242_v2  ;;  %p566_p1 = scmp.ne.s32.totalorder %s564_s24, %s565_s25  ;;  %p570_p10 = scmp.lt.s32.totalorder %s564_s24, %s809_s3 }
  0x2a   : > { %p571_p11 = scmp.lt.s32.totalorder %s569_s30, %s565_s25 }
  0x2b   : > { %268 = vmatpush.msra.mxu0 %v241_v3  ;;  %p567_p3 = pnand %p566_p1, %p731_p4 }
  0x2c   : > { %408 = vmatmul.msk.f32.vlgmr.msra.gmra.mxu0 %vm249_vm0, %v240_v4  ;;  %p572_p12 = por %p571_p11, %p570_p10 }
  0x2d   : > { %p568_p9 = pneg %p567_p3 }
  0x2f   : > { %p573_p13 = pnand %p572_p12, %p568_p9 }
  0xa9   : > { %v270_v6 = vpop.f32.mrf.mxu0 }
  0xaa   : > { %v271_v7 = vadd.f32 %v488_v5, %v270_v6 }
  0xac   : > { %v273_v8 = vmax.f32 %v271_v7, 0.0 }
  0xae   : > { %275 = vst.msk [vmem:[%s236_s21] sm:$0xff] %vm274_vm1, %v273_v8 }
  0xaf   : > { %576 = shalt.err (!%p573_p13)
}
  0xb0   : > { %419 = dma.vmem_to_hbm [thread:$0]  (%p731_p4), %s291_s22, 128, %s293_s18, %s277_s15  }
  0xb1 PF: > { %s304_s28 = sand.u32 1, %s615_s12   ;;  %p430_p0 = pnand %p401_p6, %p739_p7 }
  0xb2   : > { %s305_s23 = scalar_lea.sflag [#allocation4], %s304_s28 }
  0xb3   : > { %p431_p2 = pneg %p430_p0 }
  0xb5   : > { %610 = dma.done.wait (%p431_p2), %s305_s23, 128  }
  0xb6   : > { %612 = vsyncadd (%p431_p2), %s305_s23, 4294967168  ;;  %s20_s17 = sadd.s32 1, %s635_s17   ;;  %s816_s12 = smov %s619_s13 }
  0xb7   : > { %p17_p5 = scmp.ge.s32.totalorder %s20_s17, 4   ;;  %s817_s13 = smov %s623_s14 }
  0xb8   : > { %s818_s14 = smov %s737_s8  ;;  %s819_s15 = smov %s631_s16 }
  0xb9   : > { %s820_s16 = smov %s822_s29  ;;  %19 = sbr.rel (!%p17_p5) target bundleno = 7 (0x7), region = 85 }
  0xbe   :  { %311 = vsyncpa [#allocation3], 1 }
  0xbf   :  { %313 = vsyncpa [#allocation3 + $0x1], 1 }
  0xc0   :  { %314 = vsyncpa [#allocation6], 1 }
  0xc1   :  { %315 = vsyncpa [#allocation4], 1 }
  0xc2   :  { %317 = vsyncpa [#allocation4 + $0x1], 1 }

</bundles_post_ra>
